<compile_context>
chip_gen: v6e
topology: v6e:2x2x1
jax: 0.10.0
libtpu: 0.0.40
codegen_flags: <defaults>
</compile_context>

<pallas_src>
import functools
import math

import jax
import jax.numpy as jnp
from jax import lax
from jax.experimental import pallas as pl
from jax.experimental.pallas import tpu as pltpu

LANE = 128                     # lane width; channel dims are padded to multiples of this
_MM_DTYPE = jnp.bfloat16       # MXU operand dtype (f32 accumulation)
_FUSE_AUGMENT_MAX_N = 512      # fuse augment_adj into the down-conv kernel up to this N
_AUG_TILE = 256                # tile size for the blocked augment_adj matmul


def _mm(a, b):
    """MXU matmul: bf16 operands, f32 accumulation."""
    return jnp.dot(a.astype(_MM_DTYPE), b.astype(_MM_DTYPE),
                   preferred_element_type=jnp.float32)


# ----------------------------------------------------------------------------
# Kernel bodies
# ----------------------------------------------------------------------------
def _gcn_core(at, x, w, b):
    """Improved GCNConv on transposed dense adjacency (dst x src, no self loops).

    out = D^-1/2 (A + 2I) D^-1/2 (X W) + b, expressed as row scalings around a
    single standard matmul (no NxN eye / norm materialization).
    """
    # deg[u] = in-degree weight of u + self-loop weight 2 (improved=True) -> >= 2,
    # so rsqrt is always well defined (no masking needed).
    deg = jnp.sum(at, axis=1, keepdims=True) + 2.0          # (N, 1), f32
    dinv = lax.rsqrt(deg)                                    # (N, 1)
    xw = _mm(x, w)                                           # (N, Cout)
    y = xw * dinv                                            # src-side D^-1/2
    agg = _mm(at, y) + 2.0 * y                               # neighbors + self loop (w=2)
    return agg * dinv + b                                    # dst-side D^-1/2 + bias


def _apply_pool_scale(x, score_col):
    """Fused TopKPooling node scaling: the gathered rows still carry their own
    score in lane `score_col`, so scale x by it in-kernel (padded weight rows
    are zero, so the scaled spare lanes never reach real outputs)."""
    return x * x[:, score_col:score_col + 1]


def _conv_relu_score(at, x, w, b, p, score_col):
    """GCN conv + ReLU, then TopKPooling score tanh((h.p)/||p||) packed into the
    spare padded lane `score_col` of the output (that lane is exactly 0 in h)."""
    h = jnp.maximum(_gcn_core(at, x, w, b), 0.0)
    inv_norm = lax.rsqrt(jnp.sum(p * p))                     # padded zeros don't change ||p||
    s = jnp.tanh(jnp.sum(h * p, axis=1, keepdims=True) * inv_norm)   # (N, 1)
    cols = lax.broadcasted_iota(jnp.int32, (1, h.shape[1]), 1)
    return h + s * (cols == score_col).astype(h.dtype)


def _gcn_kernel(at_ref, x_ref, w_ref, b_ref, o_ref, *, apply_relu,
                scale_by_score, score_col):
    x = x_ref[...]
    if scale_by_score:
        x = _apply_pool_scale(x, score_col)
    out = _gcn_core(at_ref[...], x, w_ref[...], b_ref[...])
    if apply_relu:
        out = jnp.maximum(out, 0.0)
    o_ref[...] = out


def _gcn_score_kernel(at_ref, x_ref, w_ref, b_ref, p_ref, o_ref, *, score_col,
                      scale_by_score):
    x = x_ref[...]
    if scale_by_score:
        x = _apply_pool_scale(x, score_col)
    o_ref[...] = _conv_relu_score(at_ref[...], x, w_ref[...], b_ref[...],
                                  p_ref[...], score_col)


def _down_step_kernel(at_ref, x_ref, w_ref, b_ref, p_ref, xo_ref, ao_ref, *,
                      score_col, scale_by_score):
    """Fully fused down level: pool scale + GCN(+ReLU) + pool score + augment_adj,
    one launch."""
    at = at_ref[...]
    x = x_ref[...]
    if scale_by_score:
        x = _apply_pool_scale(x, score_col)
    xo_ref[...] = _conv_relu_score(at, x, w_ref[...], b_ref[...],
                                   p_ref[...], score_col)
    # augment_adj: A' = offdiag((A + I) @ (A + I)); A carries no self loops by
    # construction (original graph has none, previous augment zeroed the diag).
    n = at.shape[0]
    eye = (lax.broadcasted_iota(jnp.int32, (n, n), 0) ==
           lax.broadcasted_iota(jnp.int32, (n, n), 1)).astype(at.dtype)
    b2 = at + eye
    ao_ref[...] = _mm(b2, b2) * (1.0 - eye)


def _augment_kernel(at_ref, o_ref):
    """Single-tile augment_adj fallback."""
    at = at_ref[...]
    n = at.shape[0]
    eye = (lax.broadcasted_iota(jnp.int32, (n, n), 0) ==
           lax.broadcasted_iota(jnp.int32, (n, n), 1)).astype(at.dtype)
    b2 = at + eye
    o_ref[...] = _mm(b2, b2) * (1.0 - eye)


def _augment_tiled_kernel(al_ref, ar_ref, o_ref, acc_ref):
    """Blocked (i,j,k) augment_adj: out = offdiag((A+I)@(A+I)), VMEM f32 accum.

    Diagonal (self-loop / off-diag) handling only touches diagonal blocks."""
    i, j, k = pl.program_id(0), pl.program_id(1), pl.program_id(2)

    @pl.when(k == 0)
    def _():
        acc_ref[...] = jnp.zeros_like(acc_ref)

    t = acc_ref.shape[0]
    eye = (lax.broadcasted_iota(jnp.int32, (t, t), 0) ==
           lax.broadcasted_iota(jnp.int32, (t, t), 1)).astype(jnp.float32)

    lhs = al_ref[...] + eye * (i == k).astype(jnp.float32)
    rhs = ar_ref[...] + eye * (k == j).astype(jnp.float32)
    acc_ref[...] += _mm(lhs, rhs)

    @pl.when(k == pl.num_programs(2) - 1)
    def _():
        o_ref[...] = acc_ref[...] * (1.0 - eye * (i == j).astype(jnp.float32))


# ----------------------------------------------------------------------------
# pallas_call wrappers
# ----------------------------------------------------------------------------
def _full_spec(shape):
    return pl.BlockSpec(shape, lambda i: (0,) * len(shape))


def gcn_conv(at, x, w, b, apply_relu, scale_by_score=False, score_col=0):
    n, c_out = x.shape[0], w.shape[1]
    kernel = functools.partial(_gcn_kernel, apply_relu=apply_relu,
                               scale_by_score=scale_by_score, score_col=score_col)
    return pl.pallas_call(
        kernel,
        out_shape=jax.ShapeDtypeStruct((n, c_out), jnp.float32),
        grid=(1,),
        in_specs=[_full_spec(at.shape), _full_spec(x.shape),
                  _full_spec(w.shape), _full_spec(b.shape)],
        out_specs=_full_spec((n, c_out)),
    )(at, x, w, b)


def augment_adj(at):
    n = at.shape[0]
    if n % _AUG_TILE == 0 and n // _AUG_TILE >= 2:
        nt = n // _AUG_TILE
        return pl.pallas_call(
            _augment_tiled_kernel,
            out_shape=jax.ShapeDtypeStruct((n, n), jnp.float32),
            grid=(nt, nt, nt),
            in_specs=[pl.BlockSpec((_AUG_TILE, _AUG_TILE), lambda i, j, k: (i, k)),
                      pl.BlockSpec((_AUG_TILE, _AUG_TILE), lambda i, j, k: (k, j))],
            out_specs=pl.BlockSpec((_AUG_TILE, _AUG_TILE), lambda i, j, k: (i, j)),
            scratch_shapes=[pltpu.VMEM((_AUG_TILE, _AUG_TILE), jnp.float32)],
            compiler_params=pltpu.CompilerParams(
                dimension_semantics=("parallel", "parallel", "arbitrary"),
                vmem_limit_bytes=64 * 1024 * 1024),
        )(at, at)
    # TODO(synk): large N that is not a multiple of _AUG_TILE still takes the
    #             single-tile path; pad to the tile size before going tiled.
    return pl.pallas_call(
        _augment_kernel,
        out_shape=jax.ShapeDtypeStruct((n, n), jnp.float32),
        grid=(1,),
        in_specs=[_full_spec(at.shape)],
        out_specs=_full_spec((n, n)),
    )(at)


def down_step(at, x, w, b, p, score_col, scale_by_score):
    """One fused down level: pool scale + conv(+relu) + pool score
    (+augment when N is small)."""
    n, c_out = x.shape[0], w.shape[1]
    if n <= _FUSE_AUGMENT_MAX_N:
        kernel = functools.partial(_down_step_kernel, score_col=score_col,
                                   scale_by_score=scale_by_score)
        return pl.pallas_call(
            kernel,
            out_shape=(jax.ShapeDtypeStruct((n, c_out), jnp.float32),
                       jax.ShapeDtypeStruct((n, n), jnp.float32)),
            grid=(1,),
            in_specs=[_full_spec(at.shape), _full_spec(x.shape), _full_spec(w.shape),
                      _full_spec(b.shape), _full_spec(p.shape)],
            out_specs=(_full_spec((n, c_out)), _full_spec((n, n))),
        )(at, x, w, b, p)
    # Large graphs: keep conv+score fused, run the O(N^3) augment as a tiled kernel.
    # TODO(synk): blocked (i,j,k) tiling of the GCN aggregation itself for N where
    #             the dense NxN adjacency no longer fits a single VMEM tile.
    kernel = functools.partial(_gcn_score_kernel, score_col=score_col,
                               scale_by_score=scale_by_score)
    x_out = pl.pallas_call(
        kernel,
        out_shape=jax.ShapeDtypeStruct((n, c_out), jnp.float32),
        grid=(1,),
        in_specs=[_full_spec(at.shape), _full_spec(x.shape), _full_spec(w.shape),
                  _full_spec(b.shape), _full_spec(p.shape)],
        out_specs=_full_spec((n, c_out)),
    )(at, x, w, b, p)
    return x_out, augment_adj(at)


# ----------------------------------------------------------------------------
# GraphUNet forward (glue: top-k selection, gathers/scatters)
# ----------------------------------------------------------------------------
def _round_up(v, m):
    return ((v + m - 1) // m) * m


def _pad_cols(arr, width):
    pad = width - arr.shape[1]
    return arr if pad == 0 else jnp.pad(arr, ((0, 0), (0, pad)))


def _pad_mat(w, rows, cols):
    return jnp.pad(w, ((0, rows - w.shape[0]), (0, cols - w.shape[1])))


def graph_unet_forward(x, a, params, depth):
    in_dim = params["down_w"][0].shape[0]
    dim = params["down_w"][0].shape[1]
    out_dim = params["up_w"][-1].shape[1]

    cin_p = _round_up(in_dim, LANE)
    c_p = _round_up(dim + 1, LANE)      # +1 reserves a spare lane for the fused pool score
    cout_p = _round_up(out_dim, LANE)
    score_col = dim                      # score lives in the first padded lane

    # Lane-pad all parameters once (padded rows/cols are zero => outputs unchanged).
    down_w = [_pad_mat(params["down_w"][0], cin_p, c_p)] + \
             [_pad_mat(w, c_p, c_p) for w in params["down_w"][1:]]
    down_b = [_pad_cols(b, c_p) for b in params["down_b"]]
    pool_p = [_pad_cols(p, c_p) for p in params["pool_p"]]
    up_w = [_pad_mat(w, c_p, c_p) for w in params["up_w"][:-1]] + \
           [_pad_mat(params["up_w"][-1], c_p, cout_p)]
    up_b = [_pad_cols(b, c_p) for b in params["up_b"][:-1]] + \
           [_pad_cols(params["up_b"][-1], cout_p)]

    at = a.T                    # carry dst x src so every MXU feed is a plain matmul
    x = _pad_cols(x, cin_p)

    # level-0 down conv (+ReLU), fused with pool-0 score and augment_adj
    x, at_aug = down_step(at, x, down_w[0], down_b[0], pool_p[0], score_col,
                          scale_by_score=False)
    xs, ats, perms = [x], [at], []

    for i in range(1, depth + 1):
        # TopKPooling: score was computed inside the previous fused conv kernel.
        score = x[:, score_col]
        n = x.shape[0]
        k = int(math.ceil(0.5 * n))                # pool_ratio = 0.5, k = ceil(ratio*N)
        _, perm = lax.top_k(score, k)
        x = x[perm]                                # node scaling by score fused in next conv
        at = at_aug[perm][:, perm]                 # filter_adj on the augmented adjacency
        # TODO(synk): at very large N, fuse this perm gather into the following conv
        #             via PrefetchScalarGridSpec instead of materializing NxN in HBM.
        if i < depth:
            x, at_aug = down_step(at, x, down_w[i], down_b[i], pool_p[i], score_col,
                                  scale_by_score=True)
            xs.append(x)
            ats.append(at)
        else:
            x = gcn_conv(at, x, down_w[i], down_b[i], apply_relu=True,
                         scale_by_score=True, score_col=score_col)
        perms.append(perm)

    for i in range(depth):
        j = depth - 1 - i
        res, at_j, perm = xs[j], ats[j], perms[j]
        # unpool + sum_res skip connection in one scatter-add (perm rows are unique):
        # equivalent to up = zeros_like(res); up[perm] = x; x = res + up
        x = res.at[perm].add(x)
        # (padded lanes may carry stale score values; they never reach real outputs
        #  since the corresponding weight rows are zero and the result is sliced.)
        x = gcn_conv(at_j, x, up_w[i], up_b[i], apply_relu=(i < depth - 1))
    return x[:, :out_dim]


# ----------------------------------------------------------------------------
# Deterministic parameter init (shapes from GraphUNet.__init__)
# ----------------------------------------------------------------------------
def init_params(key, in_dim, dim, out_dim, depth):
    def glorot(k, shape):
        limit = (6.0 / (shape[0] + shape[1])) ** 0.5
        return jax.random.uniform(k, shape, jnp.float32, -limit, limit)

    n_keys = (depth + 1) + depth + depth
    keys = list(jax.random.split(key, n_keys))
    it = iter(keys)

    down_w = [glorot(next(it), (in_dim, dim))] + \
             [glorot(next(it), (dim, dim)) for _ in range(depth)]
    down_b = [jnp.zeros((1, dim), jnp.float32) for _ in range(depth + 1)]

    bound = 1.0 / math.sqrt(dim)
    pool_p = [jax.random.uniform(next(it), (1, dim), jnp.float32, -bound, bound)
              for _ in range(depth)]

    up_w = [glorot(next(it), (dim, dim)) for _ in range(depth - 1)] + \
           [glorot(next(it), (dim, out_dim))]
    up_b = [jnp.zeros((1, dim), jnp.float32) for _ in range(depth - 1)] + \
           [jnp.zeros((1, out_dim), jnp.float32)]

    return {"down_w": down_w, "down_b": down_b,
            "pool_p": pool_p, "up_w": up_w, "up_b": up_b}


# ----------------------------------------------------------------------------
if __name__ == "__main__":
    key = jax.random.PRNGKey(0)
    N, in_dim, dim, out_dim, depth = 16, 8, 32, 4, 2

    k_x, k_p = jax.random.split(key)
    x = jax.random.normal(k_x, (N, in_dim), jnp.float32)

    # undirected ring graph (both edge directions, no self loops) -> dense adjacency
    src = jnp.arange(N)
    dst = (src + 1) % N
    edge_index = jnp.concatenate(
        [jnp.stack([src, dst]), jnp.stack([dst, src])], axis=1)   # (2, 32)
    adj = jnp.zeros((N, N), jnp.float32).at[edge_index[0], edge_index[1]].set(1.0)

    params = init_params(k_p, in_dim, dim, out_dim, depth)

    out = graph_unet_forward(x, adj, params, depth)
    out = jax.block_until_ready(out)
    assert out.shape == (N, out_dim) and out.dtype == jnp.float32
    print("KERNEL_OK")
</pallas_src>

<mosaic_0001>
module attributes {stable_mosaic.version = 11 : i64} {
  func.func @_down_step_kernel(%arg0: i32, %arg1: memref<16x16xf32, #tpu.memory_space<vmem>>, %arg2: memref<16x128xf32, #tpu.memory_space<vmem>>, %arg3: memref<128x128xf32, #tpu.memory_space<vmem>>, %arg4: memref<1x128xf32, #tpu.memory_space<vmem>>, %arg5: memref<1x128xf32, #tpu.memory_space<vmem>>, %arg6: memref<16x128xf32, #tpu.memory_space<vmem>>, %arg7: memref<16x16xf32, #tpu.memory_space<vmem>>) attributes {dimension_semantics = [#tpu.dimension_semantics<arbitrary>], iteration_bounds = array<i64: 1>, scalar_prefetch = 0 : i64, scratch_operands = 0 : i64, tpu.core_type = #tpu.core_type<tc>, window_params = [{pipeline_mode = #tpu.pipeline_mode<synchronous>, transform_indices = @transform_0, window_bounds = array<i64: 16, 16>}, {pipeline_mode = #tpu.pipeline_mode<synchronous>, transform_indices = @transform_1, window_bounds = array<i64: 16, 128>}, {pipeline_mode = #tpu.pipeline_mode<synchronous>, transform_indices = @transform_2, window_bounds = array<i64: 128, 128>}, {pipeline_mode = #tpu.pipeline_mode<synchronous>, transform_indices = @transform_3, window_bounds = array<i64: 1, 128>}, {pipeline_mode = #tpu.pipeline_mode<synchronous>, transform_indices = @transform_4, window_bounds = array<i64: 1, 128>}, {pipeline_mode = #tpu.pipeline_mode<synchronous>, transform_indices = @transform_5, window_bounds = array<i64: 16, 128>}, {pipeline_mode = #tpu.pipeline_mode<synchronous>, transform_indices = @transform_6, window_bounds = array<i64: 16, 16>}]} {
    %c0 = arith.constant 0 : index
    %c0_0 = arith.constant 0 : index
    %0 = vector.load %arg1[%c0, %c0_0] : memref<16x16xf32, #tpu.memory_space<vmem>>, vector<16x16xf32>
    %c0_1 = arith.constant 0 : index
    %c0_2 = arith.constant 0 : index
    %1 = vector.load %arg2[%c0_1, %c0_2] : memref<16x128xf32, #tpu.memory_space<vmem>>, vector<16x128xf32>
    %c0_3 = arith.constant 0 : index
    %c0_4 = arith.constant 0 : index
    %2 = vector.load %arg3[%c0_3, %c0_4] : memref<128x128xf32, #tpu.memory_space<vmem>>, vector<128x128xf32>
    %c0_5 = arith.constant 0 : index
    %c0_6 = arith.constant 0 : index
    %3 = vector.load %arg4[%c0_5, %c0_6] : memref<1x128xf32, #tpu.memory_space<vmem>>, vector<1x128xf32>
    %c0_7 = arith.constant 0 : index
    %c0_8 = arith.constant 0 : index
    %4 = vector.load %arg5[%c0_7, %c0_8] : memref<1x128xf32, #tpu.memory_space<vmem>>, vector<1x128xf32>
    %cst = arith.constant dense<0.000000e+00> : vector<16xf32>
    %5 = vector.multi_reduction <add>, %0, %cst [1] : vector<16x16xf32> to vector<16xf32>
    %6 = vector.shape_cast %5 : vector<16xf32> to vector<16x1xf32>
    %cst_9 = arith.constant 2.000000e+00 : f32
    %7 = vector.broadcast %cst_9 : f32 to vector<16x1xf32>
    %8 = arith.addf %6, %7 : vector<16x1xf32>
    %9 = math.rsqrt %8 : vector<16x1xf32>
    %10 = arith.truncf %1 : vector<16x128xf32> to vector<16x128xbf16>
    %11 = arith.truncf %2 : vector<128x128xf32> to vector<128x128xbf16>
    %cst_10 = arith.constant dense<0.000000e+00> : vector<16x128xf32>
    %12 = tpu.matmul %10, %11, %cst_10 {dimension_numbers = #tpu.dot_dimension_numbers<[1], [0], [0], [1], [0, 0, 1, 1], [], []>} : vector<16x128xbf16>, vector<128x128xbf16>, vector<16x128xf32> -> vector<16x128xf32>
    %13 = vector.broadcast %9 : vector<16x1xf32> to vector<16x128xf32>
    %14 = arith.mulf %12, %13 : vector<16x128xf32>
    %15 = arith.truncf %0 : vector<16x16xf32> to vector<16x16xbf16>
    %16 = arith.truncf %14 : vector<16x128xf32> to vector<16x128xbf16>
    %cst_11 = arith.constant dense<0.000000e+00> : vector<16x128xf32>
    %17 = tpu.matmul %15, %16, %cst_11 {dimension_numbers = #tpu.dot_dimension_numbers<[1], [0], [0], [1], [0, 0, 1, 1], [], []>} : vector<16x16xbf16>, vector<16x128xbf16>, vector<16x128xf32> -> vector<16x128xf32>
    %cst_12 = arith.constant 2.000000e+00 : f32
    %18 = vector.broadcast %cst_12 : f32 to vector<16x128xf32>
    %19 = arith.mulf %18, %14 : vector<16x128xf32>
    %20 = arith.addf %17, %19 : vector<16x128xf32>
    %21 = vector.broadcast %9 : vector<16x1xf32> to vector<16x128xf32>
    %22 = arith.mulf %20, %21 : vector<16x128xf32>
    %23 = vector.broadcast %3 : vector<1x128xf32> to vector<16x128xf32>
    %24 = arith.addf %22, %23 : vector<16x128xf32>
    %cst_13 = arith.constant 0.000000e+00 : f32
    %25 = vector.broadcast %cst_13 : f32 to vector<16x128xf32>
    %26 = arith.maximumf %24, %25 : vector<16x128xf32>
    %27 = arith.mulf %4, %4 : vector<1x128xf32>
    %28 = vector.shape_cast %27 : vector<1x128xf32> to vector<1x1x128xf32>
    %cst_14 = arith.constant dense<0.000000e+00> : vector<1xf32>
    %29 = vector.multi_reduction <add>, %28, %cst_14 [1, 2] : vector<1x1x128xf32> to vector<1xf32>
    %30 = vector.shape_cast %29 : vector<1xf32> to vector<1x1x1xf32>
    %31 = vector.extract %30[0, 0, 0] : f32 from vector<1x1x1xf32>
    %32 = math.rsqrt %31 : f32
    %33 = vector.broadcast %4 : vector<1x128xf32> to vector<16x128xf32>
    %34 = arith.mulf %26, %33 : vector<16x128xf32>
    %cst_15 = arith.constant dense<0.000000e+00> : vector<16xf32>
    %35 = vector.multi_reduction <add>, %34, %cst_15 [1] : vector<16x128xf32> to vector<16xf32>
    %36 = vector.shape_cast %35 : vector<16xf32> to vector<16x1xf32>
    %37 = vector.broadcast %32 : f32 to vector<16x1xf32>
    %38 = arith.mulf %36, %37 : vector<16x1xf32>
    %39 = math.tanh %38 : vector<16x1xf32>
    %40 = tpu.iota {dimensions = array<i32: 1>} : vector<1x128xi32>
    %c32_i32 = arith.constant 32 : i32
    %41 = vector.broadcast %c32_i32 : i32 to vector<1x128xi32>
    %42 = arith.cmpi eq, %40, %41 : vector<1x128xi32>
    %43 = arith.extui %42 : vector<1x128xi1> to vector<1x128xi32>
    %44 = arith.sitofp %43 : vector<1x128xi32> to vector<1x128xf32>
    %45 = vector.broadcast %39 : vector<16x1xf32> to vector<16x128xf32>
    %46 = vector.broadcast %44 : vector<1x128xf32> to vector<16x128xf32>
    %47 = arith.mulf %45, %46 : vector<16x128xf32>
    %48 = arith.addf %26, %47 : vector<16x128xf32>
    %c0_16 = arith.constant 0 : index
    %c0_17 = arith.constant 0 : index
    %49 = vector.load %arg6[%c0_16, %c0_17] : memref<16x128xf32, #tpu.memory_space<vmem>>, vector<16x128xf32>
    tpu.vector_store %arg6[%c0_16, %c0_17], %48 {strides = array<i32>} : memref<16x128xf32, #tpu.memory_space<vmem>>, vector<16x128xf32>,
    %50 = tpu.iota {dimensions = array<i32: 0>} : vector<16x16xi32>
    %51 = tpu.iota {dimensions = array<i32: 1>} : vector<16x16xi32>
    %52 = arith.cmpi eq, %50, %51 : vector<16x16xi32>
    %53 = arith.extui %52 : vector<16x16xi1> to vector<16x16xi32>
    %54 = arith.sitofp %53 : vector<16x16xi32> to vector<16x16xf32>
    %55 = arith.addf %0, %54 : vector<16x16xf32>
    %56 = arith.truncf %55 : vector<16x16xf32> to vector<16x16xbf16>
    %57 = arith.truncf %55 : vector<16x16xf32> to vector<16x16xbf16>
    %cst_18 = arith.constant dense<0.000000e+00> : vector<16x16xf32>
    %58 = tpu.matmul %56, %57, %cst_18 {dimension_numbers = #tpu.dot_dimension_numbers<[1], [0], [0], [1], [0, 0, 1, 1], [], []>} : vector<16x16xbf16>, vector<16x16xbf16>, vector<16x16xf32> -> vector<16x16xf32>
    %cst_19 = arith.constant 1.000000e+00 : f32
    %59 = vector.broadcast %cst_19 : f32 to vector<16x16xf32>
    %60 = arith.subf %59, %54 : vector<16x16xf32>
    %61 = arith.mulf %58, %60 : vector<16x16xf32>
    %c0_20 = arith.constant 0 : index
    %c0_21 = arith.constant 0 : index
    %62 = vector.load %arg7[%c0_20, %c0_21] : memref<16x16xf32, #tpu.memory_space<vmem>>, vector<16x16xf32>
    tpu.vector_store %arg7[%c0_20, %c0_21], %61 {strides = array<i32>} : memref<16x16xf32, #tpu.memory_space<vmem>>, vector<16x16xf32>,
    return
  }
  func.func @transform_0(%arg0: i32) -> (i32, i32) {
    %c0_i32 = arith.constant 0 : i32
    %c0_i32_0 = arith.constant 0 : i32
    %c0_i32_1 = arith.constant 0 : i32
    return %c0_i32, %c0_i32_0 : i32, i32
  }
  func.func @transform_1(%arg0: i32) -> (i32, i32) {
    %c0_i32 = arith.constant 0 : i32
    %c0_i32_0 = arith.constant 0 : i32
    %c0_i32_1 = arith.constant 0 : i32
    return %c0_i32, %c0_i32_0 : i32, i32
  }
  func.func @transform_2(%arg0: i32) -> (i32, i32) {
    %c0_i32 = arith.constant 0 : i32
    %c0_i32_0 = arith.constant 0 : i32
    %c0_i32_1 = arith.constant 0 : i32
    return %c0_i32, %c0_i32_0 : i32, i32
  }
  func.func @transform_3(%arg0: i32) -> (i32, i32) {
    %c0_i32 = arith.constant 0 : i32
    %c0_i32_0 = arith.constant 0 : i32
    %c0_i32_1 = arith.constant 0 : i32
    return %c0_i32, %c0_i32_0 : i32, i32
  }
  func.func @transform_4(%arg0: i32) -> (i32, i32) {
    %c0_i32 = arith.constant 0 : i32
    %c0_i32_0 = arith.constant 0 : i32
    %c0_i32_1 = arith.constant 0 : i32
    return %c0_i32, %c0_i32_0 : i32, i32
  }
  func.func @transform_5(%arg0: i32) -> (i32, i32) {
    %c0_i32 = arith.constant 0 : i32
    %c0_i32_0 = arith.constant 0 : i32
    %c0_i32_1 = arith.constant 0 : i32
    return %c0_i32, %c0_i32_0 : i32, i32
  }
  func.func @transform_6(%arg0: i32) -> (i32, i32) {
    %c0_i32 = arith.constant 0 : i32
    %c0_i32_0 = arith.constant 0 : i32
    %c0_i32_1 = arith.constant 0 : i32
    return %c0_i32, %c0_i32_0 : i32, i32
  }
}

</mosaic_0001>

<bundles_post_ra>
// kernel: tpu_custom_call.1
= control target key start
LH: loop header
LB: loop body
LE: loop exit
PB: predicated region body
PF: predicated region fallthrough
CT: control target
= control target key end

     0   :  { %12 = vsyncpa [#allocation3], 0  ;;  %s665_s0 = inlined_call_operand.hbm [shape: f32[16,16], index: 0, kind: input, shape index: {}]   ;;  %s666_s1 = inlined_call_operand.hbm [shape: f32[16,128], index: 1, kind: input, shape index: {}]   ;;  %s667_s2 = inlined_call_operand.hbm [shape: f32[128,128], index: 2, kind: input, shape index: {}]   ;;  %s668_s3 = inlined_call_operand.vmem [shape: f32[1,128], index: 3, kind: input, shape index: {}]   ;;  %s669_s4 = inlined_call_operand.vmem [shape: f32[1,128], index: 4, kind: input, shape index: {}]   ;;  %s670_s5 = inlined_call_operand.hbm [shape: f32[16,128], index: 5, kind: output, shape index: {0}]   ;;  %s671_s6 = inlined_call_operand.hbm [shape: f32[16,16], index: 6, kind: output, shape index: {1}]  }
   0x1   :  { %13 = vsyncpa [#allocation6], 0 }
   0x2   :  { %14 = vsyncpa [#allocation4], 0 }
   0x3   :  { %15 = vsyncpa [#allocation10], 0  ;;  %s532_s21 = smov [#allocation5]   ;;  %s533_s23 = smov [#allocation2]  }
   0x4   :  { %s33_s22 = sshll.u32 %s532_s21, 4  ;;  %s21_s24 = sshll.u32 %s533_s23, 4  ;;  %s34_s22 = int_to_ptr.vmem [resolvable:$true] %s33_s22  ;;  %s22_s24 = int_to_ptr.vmem [resolvable:$true] %s21_s24 }
   0x5   :  { %s432_s25 = scalar_lea.vmem %s34_s22, 256  ;;  %p437_p1 = scmp.lt.s32.totalorder %s34_s22, %s34_s22 }
   0x6   :  { %p433_p0 = scmp.ne.s32.totalorder %s34_s22, %s432_s25  ;;  %p438_p2 = scmp.lt.s32.totalorder %s432_s25, %s432_s25 }
   0x8   :  { %p439_p3 = por %p438_p2, %p437_p1 }
   0xa   :  { %p440_p4 = pnand %p439_p3, %p433_p0 }
   0xc   :  { %443 = shalt.err (!%p440_p4)
}
   0xd   :  { %s534_s26 = smov 128   ;;  %s535_s27 = smov 8  }
   0xe   :  { %39 = dma.hbm_to_vmem [thread:$0]  %s666_s1, 256, %s34_s22, [#allocation6], %s534_s26, %s534_s26, %s535_s27  }
   0xf   :  { %s452_s30 = scalar_lea.vmem %s22_s24, 256  ;;  %p457_p6 = scmp.lt.s32.totalorder %s22_s24, %s22_s24 }
  0x10   :  { %p453_p5 = scmp.ne.s32.totalorder %s22_s24, %s452_s30  ;;  %p458_p7 = scmp.lt.s32.totalorder %s452_s30, %s452_s30 }
  0x12   :  { %p459_p8 = por %p458_p7, %p457_p6 }
  0x14   :  { %p460_p9 = pnand %p459_p8, %p453_p5 }
  0x16   :  { %463 = shalt.err (!%p460_p9)
}
  0x17   :  { %27 = dma.hbm_to_vmem [thread:$0]  %s665_s0, 256, %s22_s24, [#allocation3], %s534_s26, %s534_s26, %s535_s27  }
  0x18   :  { %s536_s9 = smov [#allocation7]  }
  0x19   :  { %s45_s10 = sshll.u32 %s536_s9, 4  ;;  %s46_s10 = int_to_ptr.vmem [resolvable:$true] %s45_s10 }
  0x1a   :  { %s472_s11 = scalar_lea.vmem %s46_s10, 2048  ;;  %p477_p11 = scmp.lt.s32.totalorder %s46_s10, %s46_s10 }
  0x1b   :  { %p473_p10 = scmp.ne.s32.totalorder %s46_s10, %s472_s11  ;;  %p478_p12 = scmp.lt.s32.totalorder %s472_s11, %s472_s11 }
  0x1d   :  { %p479_p13 = por %p478_p12, %p477_p11 }
  0x1f   :  { %p480_p0 = pnand %p479_p13, %p473_p10 }
  0x21   :  { %483 = shalt.err (!%p480_p0)
}
  0x22   :  { %51 = dma.hbm_to_vmem [thread:$0]  %s667_s2, 2048, %s46_s10, [#allocation6], %s534_s26, %s534_s26, %s535_s27  }
  0x23   :  { %524 = dma.done.wait [#allocation3], 256  }
  0x24   :  { %525 = vsyncadd [#allocation3], 4294967040 }
  0x25   :  { %526 = dma.done.wait [#allocation6], 2304  }
  0x26   :  { %527 = vsyncadd [#allocation6], 4294964992  ;;  %v227_v0 = vlaneseq  ;;  %v537_v1 = vmov 0.0   ;;  %vm538_vm0 = vmmov 0   ;;  %v84_v5 = vld [vmem:[#allocation7 + $0x70] sm:$0xff]  ;;  %v85_v6 = vld [vmem:[#allocation7 + $0x78] sm:$0xff] }
  0x27   :  { %369 = vmatprep.subr.bf16.mxu0 %v537_v1  ;;  %385 = vmatprep.mubr.msk.bf16.mxu0 %vm538_vm0, %v537_v1  ;;  %v82_v7 = vld [vmem:[#allocation7 + $0x60] sm:$0xff]  ;;  %v107_v8 = vpack.c.bf16 %v85_v6, %v84_v5  ;;  %v83_v9 = vld [vmem:[#allocation7 + $0x68] sm:$0xff]  ;;  %v80_v11 = vld [vmem:[#allocation7 + $0x50] sm:$0xff]  ;;  %vm88_vm3 = vcmask 130048   ;;  %vm212_vm4 = vcmask 1040384  }
  0x28   :  { %v597_v2 = vshrl.u32 %v227_v0, 7  ;;  %389 = vmatprep.subr.bf16.mxu1 %v537_v1  ;;  %391 = vmatprep.mubr.msk.bf16.mxu1 %vm538_vm0, %v537_v1  ;;  %v602_v3 = vand.u32 127, %v227_v0  ;;  %v106_v10 = vpack.c.bf16 %v83_v9, %v82_v7  ;;  %v81_v12 = vld [vmem:[#allocation7 + $0x58] sm:$0xff]  ;;  %v615_v15 = vld [vmem:[#allocation2] sm:$0xff]  ;;  %v617_v16 = vld [vmem:[#allocation2 + $0x8] sm:$0xff] }
  0x29   :  { %370 = vmatpush3.bf16.msra.mxu0 %v107_v8  ;;  %v105_v17 = vpack.c.bf16 %v81_v12, %v80_v11  ;;  %v89_v18 = vsel %vm88_vm3, %v615_v15, 0.0  ;;  %v151_v20 = vpack.c.bf16 %v617_v16, %v615_v15  ;;  %v78_v21 = vld [vmem:[#allocation7 + $0x40] sm:$0xff]  ;;  %v79_v22 = vld [vmem:[#allocation7 + $0x48] sm:$0xff]  ;;  %v92_v24 = vsel %vm88_vm3, %v617_v16, 0.0  ;;  %v76_v27 = vld [vmem:[#allocation7 + $0x30] sm:$0xff] }
  0x2a   :  { %v256_v4 = vadd.s32 8, %v597_v2  ;;  %vm257_vm1 = vcmp.eq.s32.totalorder %v597_v2, %v602_v3  ;;  %371 = vmatprep.subr.bf16.mxu0 %v537_v1  ;;  %90 = vadd.xlane.f32.xlu0 %v89_v18  ;;  %v104_v26 = vpack.c.bf16 %v79_v22, %v78_v21  ;;  %v77_v28 = vld [vmem:[#allocation7 + $0x38] sm:$0xff]  ;;  %v74_v30 = vld [vmem:[#allocation7 + $0x20] sm:$0xff]  ;;  %v75_v31 = vld [vmem:[#allocation7 + $0x28] sm:$0xff]  ;;  %v229_v9 = vsub.s32 0, %v597_v2 }
  0x2b   :  { %v610_v13 = vsel %vm257_vm1, 1.0, %v537_v1  ;;  %v103_v29 = vpack.c.bf16 %v77_v28, %v76_v27  ;;  %v102_v32 = vpack.c.bf16 %v75_v31, %v74_v30  ;;  %v72_v33 = vld [vmem:[#allocation7 + $0x10] sm:$0xff]  ;;  %v73_v34 = vld [vmem:[#allocation7 + $0x18] sm:$0xff]  ;;  %v70_v36 = vld [vmem:[#allocation7] sm:$0xff] }
  0x2c   :  { %vm258_vm2 = vcmp.eq.s32.totalorder %v256_v4, %v602_v3  ;;  %v263_v19 = vadd.f32 %v610_v13, %v615_v15  ;;  %v101_v35 = vpack.c.bf16 %v73_v34, %v72_v33  ;;  %v71_v37 = vld [vmem:[#allocation7 + $0x8] sm:$0xff]  ;;  %v68_v39 = vld [vmem:[#allocation5] sm:$0xff]  ;;  %v69_v40 = vld [vmem:[#allocation5 + $0x8] sm:$0xff]  ;;  %v310_v27 = vsub.f32 1.0, %v610_v13 }
  0x2d   :  { %v613_v14 = vsel %vm258_vm2, 1.0, %v537_v1  ;;  %372 = vmatpush3.bf16.msra.mxu0 %v106_v10  ;;  %v100_v38 = vpack.c.bf16 %v71_v37, %v70_v36  ;;  %v99_v41 = vpack.c.bf16 %v69_v40, %v68_v39  ;;  %v87_v42 = vld [vmem:[%s669_s4] sm:$0x1] }
  0x2e   :  { %373 = vmatprep.subr.bf16.mxu0 %v537_v1  ;;  %v264_v23 = vadd.f32 %v613_v14, %v617_v16  ;;  %93 = vadd.xlane.f32.xlu0 %v92_v24  ;;  %v211_v43 = vmul.f32 %v87_v42, %v87_v42  ;;  %v351_v11 = vld [vmem:[%s668_s3] ss:$0 sm:$0xff]  ;;  %v311_v28 = vsub.f32 1.0, %v613_v14  ;;  %s539_s3 = smov [#allocation9]  }
  0x2f   :  { %s333_s15 = sshll.u32 %s539_s3, 4  ;;  %s334_s15 = int_to_ptr.vmem [resolvable:$true] %s333_s15 }
  0x30   :  { %v265_v25 = vpack.c.bf16 %v264_v23, %v263_v19  ;;  %v213_v44 = vsel %vm212_vm4, %v211_v43, 0.0  ;;  %v230_v19 = vrot.slane %v87_v42, %v229_v9  ;;  %s484_s16 = scalar_lea.vmem %s334_s15, 256  ;;  %p489_p2 = scmp.lt.s32.totalorder %s334_s15, %s334_s15 }
  0x31   :  { %374 = vmatpush3.bf16.msra.mxu0 %v105_v17  ;;  %214 = vadd.xlane.f32.xlu1 %v213_v44  ;;  %p485_p1 = scmp.ne.s32.totalorder %s334_s15, %s484_s16  ;;  %p490_p3 = scmp.lt.s32.totalorder %s484_s16, %s484_s16 }
  0x32   :  { %375 = vmatprep.subr.bf16.mxu0 %v537_v1 }
  0x33   :  { %p491_p4 = por %p490_p3, %p489_p2 }
  0x35   :  { %376 = vmatpush3.bf16.msra.mxu0 %v104_v26  ;;  %p492_p5 = pnand %p491_p4, %p485_p1 }
  0x36   :  { %377 = vmatprep.subr.bf16.mxu0 %v537_v1 }
  0x39   :  { %378 = vmatpush3.bf16.msra.mxu0 %v103_v29 }
  0x3a   :  { %379 = vmatprep.subr.bf16.mxu0 %v537_v1 }
  0x3d   :  { %380 = vmatpush3.bf16.msra.mxu0 %v102_v32 }
  0x3e   :  { %381 = vmatprep.subr.bf16.mxu0 %v537_v1 }
  0x41   :  { %382 = vmatpush3.bf16.msra.mxu0 %v101_v35 }
  0x42   :  { %383 = vmatprep.subr.bf16.mxu0 %v537_v1 }
  0x45   :  { %384 = vmatpush3.bf16.msra.mxu0 %v100_v38 }
  0x48   :  { %386 = vmatmul.mubr.bf16.vlgmr.msra.gmra.mxu0 %v99_v41 }
  0xb3   :  { %v91_v45 = vpop.xlane.xlu0 %90 }
  0xb4   :  { %v95_v47 = vadd.f32 2.0, %v91_v45 }
  0xb6   :  { %414 = vrsqrt.f32 %v95_v47 }
  0xb7   :  { %v94_v46 = vpop.xlane.xlu0 %93 }
  0xb8   :  { %v96_v48 = vadd.f32 2.0, %v94_v46 }
  0xba   :  { %416 = vrsqrt.f32 %v96_v48  ;;  %v215_v58 = vpop.xlane.xlu1 %214 }
  0xbb   :  { %v216_v59 = vrot.slane %v215_v58, 4 }
  0xbd   :  { %v217_v60 = vadd.f32 %v216_v59, %v215_v58 }
  0xbf   :  { %v218_v61 = vrot.slane %v217_v60, 2 }
  0xc1   :  { %v219_v62 = vadd.f32 %v218_v61, %v217_v60 }
  0xc3   :  { %v415_v50 = vpop.eup %414  ;;  %v220_v63 = vrot.slane %v219_v62, 1 }
  0xc5   :  { %v221_v0 = vadd.f32 %v220_v63, %v219_v62 }
  0xc7   :  { %v417_v51 = vpop.eup %416  ;;  %401 = vpush %v221_v0 }
  0xf8   :  { %s402_s4 = spop %401 }
  0xf9   :  { %v223_v4 = vstv %s402_s4 }
  0xfa   :  { %418 = vrsqrt.f32 %v223_v4 }
 0x107   :  { %v419_v5 = vpop.eup %418 }
 0x108   :  { %v142_v49 = vpop.f32.mrf.mxu0  ;;  %403 = vpush %v419_v5 }
 0x109   :  { %v149_v54 = vmul.f32 %v415_v50, %v142_v49 }
 0x10a   :  { %v387_v52 = vpop.f32.mrf.mxu0 }
 0x10b   :  { %v153_v6 = vmul.f32 2.0, %v149_v54 }
 0x10c   :  { %v145_v53 = vpop.f32.mrf.mxu0 }
 0x10d   :  { %v150_v55 = vmul.f32 %v417_v51, %v145_v53 }
 0x10e   :  { %v388_v56 = vpop.f32.mrf.mxu0 }
 0x10f   :  { %v152_v57 = vpack.c.bf16 %v150_v55, %v149_v54  ;;  %v154_v15 = vmul.f32 2.0, %v150_v55 }
 0x111   :  { %390 = vmatpush3.bf16.msra.mxu1 %v152_v57 }
 0x112   :  { %395 = vmatprep.subr.bf16.mxu1 %v537_v1 }
 0x114   :  { %392 = vmatmul.mubr.msk.bf16.vlgmr.msra.gmra.mxu1 %vm88_vm3, %v151_v20 }
 0x115   :  { %396 = vmatpush3.bf16.msra.mxu1 %v265_v25  ;;  %397 = vmatprep.mubr.msk.bf16.mxu1 %vm538_vm0, %v537_v1 }
 0x11c   :  { %398 = vmatmul.mubr.msk.bf16.vlgmr.msra.gmra.mxu1 %vm88_vm3, %v265_v25 }
 0x1d4   :  { %v192_v7 = vpop.f32.mrf.mxu1 }
 0x1d5   :  { %v193_v8 = vadd.f32 %v192_v7, %v153_v6 }
 0x1d6   :  { %v393_v10 = vpop.f32.mrf.mxu1 }
 0x1d7   :  { %v199_v12 = vmul.f32 %v415_v50, %v193_v8 }
 0x1d8   :  { %v195_v16 = vpop.f32.mrf.mxu1 }
 0x1d9   :  { %v196_v17 = vadd.f32 %v195_v16, %v154_v15  ;;  %v207_v18 = vadd.f32 %v351_v11, %v199_v12 }
 0x1da   :  { %v394_v20 = vpop.f32.mrf.mxu1 }
 0x1db   :  { %v200_v21 = vmul.f32 %v417_v51, %v196_v17  ;;  %v209_v22 = vmax.f32 %v207_v18, 0.0 }
 0x1dc   :  { %v303_v2 = vpop.f32.mrf.mxu1 }
 0x1dd   :  { %v232_v23 = vmul.f32 %v230_v19, %v209_v22  ;;  %v208_v24 = vadd.f32 %v351_v11, %v200_v21  ;;  %v312_v29 = vmul.f32 %v310_v27, %v303_v2 }
 0x1de   :  { %v399_v30 = vpop.f32.mrf.mxu1 }
 0x1df   :  { %234 = vadd.xlane.f32.xlu1 %v232_v23  ;;  %v210_v25 = vmax.f32 %v208_v24, 0.0  ;;  %314 = vst.msk [vmem:[#allocation9] sm:$0xff] %vm88_vm3, %v312_v29 }
 0x1e0   :  { %v306_v31 = vpop.f32.mrf.mxu1 }
 0x1e1   :  { %v233_v26 = vmul.f32 %v230_v19, %v210_v25  ;;  %v313_v32 = vmul.f32 %v311_v28, %v306_v31 }
 0x1e2   :  { %v400_v33 = vpop.f32.mrf.mxu1 }
 0x1e3   :  { %236 = vadd.xlane.f32.xlu0 %v233_v26  ;;  %315 = vst.msk [vmem:[#allocation9 + $0x8] sm:$0xff] %vm88_vm3, %v313_v32 }
 0x1e4   :  { %495 = shalt.err (!%p492_p5)
}
 0x1e5   :  { %339 = dma.vmem_to_hbm [thread:$0]  %s334_s15, 256, %s671_s6, [#allocation10], %s534_s26, %s534_s26, %s535_s27   ;;  %vm245_vm5 = vcmp.eq.s32.totalorder %v602_v3, 32 }
 0x1e6   :  { %s404_s19 = spop %403  ;;  %v352_v37 = vsel %vm245_vm5, 1.0, %v537_v1  ;;  %s540_s20 = smov [#allocation8]  }
 0x1e7   :  { %v238_v13 = vstv %s404_s19  ;;  %s321_s21 = sshll.u32 %s540_s20, 4  ;;  %s322_s21 = int_to_ptr.vmem [resolvable:$true] %s321_s21 }
 0x1e8   :  { %s504_s6 = scalar_lea.vmem %s322_s21, 256  ;;  %p509_p7 = scmp.lt.s32.totalorder %s322_s21, %s322_s21 }
 0x1e9   :  { %p505_p6 = scmp.ne.s32.totalorder %s322_s21, %s504_s6  ;;  %p510_p8 = scmp.lt.s32.totalorder %s504_s6, %s504_s6 }
 0x1eb   :  { %p511_p9 = por %p510_p8, %p509_p7 }
 0x1ed   :  { %p512_p10 = pnand %p511_p9, %p505_p6 }
 0x268   :  { %v235_v14 = vpop.xlane.xlu1 %234 }
 0x269   :  { %v239_v34 = vmul.f32 %v238_v13, %v235_v14 }
 0x26b   :  { %420 = vtanh.f32 %v239_v34 }
 0x26c   :  { %v237_v35 = vpop.xlane.xlu0 %236 }
 0x26d   :  { %v240_v36 = vmul.f32 %v238_v13, %v237_v35 }
 0x26f   :  { %422 = vtanh.f32 %v240_v36 }
 0x278   :  { %v421_v38 = vpop.eup %420 }
 0x279   :  { %v248_v39 = vmul.f32 %v421_v38, %v352_v37 }
 0x27b   :  { %v250_v40 = vadd.f32 %v248_v39, %v209_v22 }
 0x27c   :  { %v423_v41 = vpop.eup %422 }
 0x27d   :  { %v249_v42 = vmul.f32 %v423_v41, %v352_v37  ;;  %252 = vst [vmem:[#allocation8] sm:$0xff] %v250_v40 }
 0x27f   :  { %v251_v43 = vadd.f32 %v249_v42, %v210_v25 }
 0x281   :  { %253 = vst [vmem:[#allocation8 + $0x8] sm:$0xff] %v251_v43 }
 0x282   :  { %515 = shalt.err (!%p512_p10)
}
 0x283   :  { %327 = dma.vmem_to_hbm [thread:$0]  %s322_s21, 256, %s670_s5, [#allocation4], %s534_s26, %s534_s26, %s535_s27  }
 0x284   :  { %528 = dma.done.wait [#allocation4], 256  }
 0x285   :  { %529 = vsyncadd [#allocation4], 4294967040 }
 0x286   :  { %530 = dma.done.wait [#allocation10], 256  }
 0x287   :  { %531 = vsyncadd [#allocation10], 4294967040 }
 0x288   :  { %346 = vsyncpa [#allocation3], 1 }
 0x289   :  { %347 = vsyncpa [#allocation6], 1 }
 0x28a   :  { %348 = vsyncpa [#allocation4], 1 }
 0x28b   :  { %349 = vsyncpa [#allocation10], 1 }

</bundles_post_ra>
